<compile_context>
chip_gen: v7x
topology: tpu7x:2x2x1
jax: 0.10.0
libtpu: 0.0.40
codegen_flags: <defaults>
</compile_context>

<pallas_src>
import functools

import jax
import jax.numpy as jnp
from jax.experimental import pallas as pl
from jax.experimental.pallas import tpu as pltpu


def _round_up(x, m):
    return ((x + m - 1) // m) * m


# q @ k^T style contraction (both operands contract their last dim).
_TRANS_B_DIMS = (((1,), (1,)), ((), ()))


def _fcnn_kernel(n_hidden, x_ref, *refs):
    """refs = [(w, b) * n_hidden, w_out_blk, b_out, o]."""
    o_ref = refs[-1]
    params = refs[:-1]

    h = x_ref[...]                                   # (TB, D_pad)
    idx = 0
    for _ in range(n_hidden):
        w_ref, b_ref = params[idx], params[idx + 1]
        idx += 2
        w = w_ref[...]
        # Linear (+ folded BatchNorm) on the MXU; bias add + ReLU stay f32 on
        # the VPU. Dropout in eval mode is identity.
        z = jnp.dot(h.astype(w.dtype), w, preferred_element_type=jnp.float32)
        h = jnp.maximum(z + b_ref[...], 0.0)

    w_out_ref, b_out_ref = params[idx], params[idx + 1]
    # Final Linear(H_last, 1): contract the feature axis as an A @ B^T matmul
    # against an 8-row weight block (row 0 real, rows 1..7 zero) so the result
    # lands lane-dense as (8, TB) -- no (TB, 1) masked stores.
    o_ref[...] = jax.lax.dot_general(
        w_out_ref[...], h.astype(w_out_ref.dtype),
        dimension_numbers=_TRANS_B_DIMS,
        preferred_element_type=jnp.float32) + b_out_ref[...]


def fcnn_forward(x, hidden_params, out_w, out_b, *, block_b=1024,
                 use_bf16=False):
    """x: (B, D). hidden_params: list of (w, b, bn_scale, bn_shift) with
    w stored (in_dim, out_dim). out_w: (H_last, 1), out_b: (1, 1).
    Returns (B,) like the PyTorch module's .squeeze(-1)."""
    B, D_in = x.shape
    if B == 0:
        raise ValueError(f"Empty batch received, shape: {x.shape}")

    compute_dtype = jnp.bfloat16 if use_bf16 else jnp.float32
    itemsize = jnp.dtype(compute_dtype).itemsize
    D_pad = _round_up(D_in, 128)

    # --- fold BatchNorm into the Linear params & pad features to 128 -------
    folded = []
    dims_pad = [D_pad]
    weight_bytes = 0
    prev_pad = D_pad
    for (w, b, s, t) in hidden_params:
        in_dim, out_dim = w.shape
        out_pad = _round_up(out_dim, 128)
        w_f = (w * s).astype(jnp.float32)            # (in, out) * (1, out)
        b_f = (b * s + t).astype(jnp.float32)        # (1, out)
        w_f = jnp.pad(w_f, ((0, prev_pad - in_dim), (0, out_pad - out_dim)))
        b_f = jnp.pad(b_f, ((0, 0), (0, out_pad - out_dim)))
        w_f = w_f.astype(compute_dtype)
        weight_bytes += w_f.size * itemsize + b_f.size * 4
        folded.append((w_f, b_f))
        dims_pad.append(out_pad)
        prev_pad = out_pad

    # Final layer as an (8, H_pad) block; keep f32 (tiny op, exactness).
    h_last = out_w.shape[0]
    w_out_blk = jnp.zeros((8, prev_pad), jnp.float32)
    w_out_blk = w_out_blk.at[0, :h_last].set(
        jnp.reshape(out_w, (-1,)).astype(jnp.float32))
    b_out = jnp.reshape(out_b, (1, 1)).astype(jnp.float32)
    weight_bytes += w_out_blk.size * 4 + b_out.size * 4

    # --- per-generation VMEM budget -----------------------------------------
    try:
        vmem_cap = int(pltpu.get_tpu_info().vmem_capacity_bytes)
    except Exception:
        vmem_cap = 64 * 1024 * 1024          # conservative (v7x per-TC VMEM)
    vmem_ceiling = (vmem_cap * 3) // 4       # ~96 MiB v5e/v6e, ~48 MiB v7x

    # --- batch tiling ---------------------------------------------------------
    # Cap TB so the double-buffered x tile stays well inside VMEM.
    x_tile_budget = min(24 * 1024 * 1024, vmem_ceiling // 3)
    tb_cap = max(128, (x_tile_budget // (2 * D_pad * itemsize)) // 128 * 128)
    tb_target = min(max(128, _round_up(block_b, 128)), tb_cap)

    B8 = _round_up(B, 8)
    if B8 <= tb_target:
        TB, B_pad = B8, B8                   # one tile == whole (padded) batch
    else:
        # >= 2 grid steps (lets v7x shard the "parallel" axis over its 2 TCs);
        # multiple of 128 keeps x / out blocks (8,128)-dense and legal.
        TB = min(tb_target, max(128, _round_up(pl.cdiv(B, 2), 128)))
        B_pad = _round_up(B, TB)
    grid = (B_pad // TB,)

    x = jnp.pad(x.astype(compute_dtype),
                ((0, B_pad - B), (0, D_pad - D_in)))

    # --- VMEM / cost bookkeeping ---------------------------------------------
    max_dim = max(dims_pad)
    x_tile_bytes = 2 * TB * D_pad * itemsize         # pipeline double-buffers x
    out_tile_bytes = 2 * 8 * TB * 4
    act_bytes = 3 * TB * max_dim * 4                  # matmul/epilogue temps

    flops = 2 * B_pad * sum(dims_pad[i] * dims_pad[i + 1]
                            for i in range(len(dims_pad) - 1))
    flops += 2 * B_pad * 8 * prev_pad                  # final A @ B^T
    bytes_accessed = B_pad * D_pad * itemsize + weight_bytes + 8 * B_pad * 4
    cost = pl.CostEstimate(flops=flops, transcendentals=0,
                           bytes_accessed=bytes_accessed)

    flat = [x] + [p for wb in folded for p in wb] + [w_out_blk, b_out]
    param_arrays = flat[1:]

    kernel = functools.partial(_fcnn_kernel, len(hidden_params))
    out_shape = jax.ShapeDtypeStruct((8, B_pad), jnp.float32)
    out_spec = pl.BlockSpec((8, TB), lambda i: (0, i))

    def _call(weight_pipeline_mode):
        wbuf = 1 if weight_pipeline_mode is not None else 2
        need = x_tile_bytes + out_tile_bytes + wbuf * weight_bytes + act_bytes
        vmem_limit = int(min(vmem_ceiling,
                             max(need * 5 // 4, 16 * 1024 * 1024)))
        in_specs = [pl.BlockSpec((TB, D_pad), lambda i: (i, 0))]
        for arr in param_arrays:
            kw = ({} if weight_pipeline_mode is None
                  else {"pipeline_mode": weight_pipeline_mode})
            in_specs.append(pl.BlockSpec(arr.shape, lambda i: (0, 0), **kw))
        return pl.pallas_call(
            kernel,
            grid=grid,
            out_shape=out_shape,
            in_specs=in_specs,
            out_specs=out_spec,
            compiler_params=pltpu.CompilerParams(
                dimension_semantics=("parallel",),
                vmem_limit_bytes=vmem_limit),
            cost_estimate=cost,
        )(*flat)

    try:
        # Grid-invariant weights/biases: single-buffer them (halves their
        # resident VMEM footprint; matters most on v7x's 64 MiB per-TC VMEM).
        out = _call(pl.Buffered(1))
    except Exception:
        # Fallback if this jax build rejects pipeline_mode on pallas_call.
        out = _call(None)

    return out[0, :B]  # .squeeze(-1)


def _reference_forward(x, hidden_params, out_w, out_b):
    h = x
    for (w, b, s, t) in hidden_params:
        h = jnp.maximum((h @ w + b) * s + t, 0.0)
    return (h @ out_w + out_b)[:, 0]


if __name__ == "__main__":
    # Small shapes consistent with the module: FCNN(input_dim=64, hidden_dims=[32, 16])
    B, input_dim = 8, 64
    hidden_dims = [32, 16]
    eps = 1e-5

    key = jax.random.PRNGKey(0)
    key, kx = jax.random.split(key)
    x = jax.random.normal(kx, (B, input_dim), dtype=jnp.float32)

    hidden_params = []
    prev = input_dim
    for dim in hidden_dims:
        key, kw, kb, kg, kbe, km, kv = jax.random.split(key, 7)
        w = jax.random.normal(kw, (prev, dim), dtype=jnp.float32) * (1.0 / jnp.sqrt(prev))
        b = jax.random.normal(kb, (1, dim), dtype=jnp.float32) * 0.1
        gamma = 1.0 + 0.1 * jax.random.normal(kg, (1, dim), dtype=jnp.float32)
        beta = 0.1 * jax.random.normal(kbe, (1, dim), dtype=jnp.float32)
        running_mean = 0.1 * jax.random.normal(km, (1, dim), dtype=jnp.float32)
        running_var = 0.5 + jnp.abs(jax.random.normal(kv, (1, dim), dtype=jnp.float32))
        bn_scale = gamma / jnp.sqrt(running_var + eps)
        bn_shift = beta - running_mean * bn_scale
        hidden_params.append((w, b, bn_scale, bn_shift))
        prev = dim

    key, kw, kb = jax.random.split(key, 3)
    out_w = jax.random.normal(kw, (prev, 1), dtype=jnp.float32) * (1.0 / jnp.sqrt(prev))
    out_b = jax.random.normal(kb, (1, 1), dtype=jnp.float32) * 0.1

    y = fcnn_forward(x, hidden_params, out_w, out_b)
    y = jax.block_until_ready(y)
    assert y.shape == (B,)

    y_ref = _reference_forward(x, hidden_params, out_w, out_b)
    assert jnp.allclose(y, y_ref, atol=1e-4, rtol=1e-4), (y, y_ref)

    print("KERNEL_OK")
</pallas_src>

<mosaic_0001>
module attributes {stable_mosaic.version = 11 : i64} {
  func.func @_fcnn_kernel(%arg0: i32, %arg1: memref<8x128xf32, #tpu.memory_space<vmem>>, %arg2: memref<128x128xf32, #tpu.memory_space<vmem>>, %arg3: memref<1x128xf32, #tpu.memory_space<vmem>>, %arg4: memref<128x128xf32, #tpu.memory_space<vmem>>, %arg5: memref<1x128xf32, #tpu.memory_space<vmem>>, %arg6: memref<8x128xf32, #tpu.memory_space<vmem>>, %arg7: memref<1x1xf32, #tpu.memory_space<vmem>>, %arg8: memref<8x8xf32, #tpu.memory_space<vmem>>) attributes {dimension_semantics = [#tpu.dimension_semantics<parallel>], iteration_bounds = array<i64: 1>, scalar_prefetch = 0 : i64, scratch_operands = 0 : i64, tpu.core_type = #tpu.core_type<tc>, window_params = [{transform_indices = @transform_0, window_bounds = array<i64: 8, 128>}, {pipeline_mode = #tpu.pipeline_mode<synchronous>, transform_indices = @transform_1, window_bounds = array<i64: 128, 128>}, {pipeline_mode = #tpu.pipeline_mode<synchronous>, transform_indices = @transform_2, window_bounds = array<i64: 1, 128>}, {pipeline_mode = #tpu.pipeline_mode<synchronous>, transform_indices = @transform_3, window_bounds = array<i64: 128, 128>}, {pipeline_mode = #tpu.pipeline_mode<synchronous>, transform_indices = @transform_4, window_bounds = array<i64: 1, 128>}, {pipeline_mode = #tpu.pipeline_mode<synchronous>, transform_indices = @transform_5, window_bounds = array<i64: 8, 128>}, {pipeline_mode = #tpu.pipeline_mode<synchronous>, transform_indices = @transform_6, window_bounds = array<i64: 1, 1>}, {transform_indices = @transform_7, window_bounds = array<i64: 8, 8>}]} {
    %c0 = arith.constant 0 : index
    %c0_0 = arith.constant 0 : index
    %0 = vector.load %arg1[%c0, %c0_0] : memref<8x128xf32, #tpu.memory_space<vmem>>, vector<8x128xf32>
    %c0_1 = arith.constant 0 : index
    %c0_2 = arith.constant 0 : index
    %1 = vector.load %arg2[%c0_1, %c0_2] : memref<128x128xf32, #tpu.memory_space<vmem>>, vector<128x128xf32>
    %cst = arith.constant dense<0.000000e+00> : vector<8x128xf32>
    %2 = tpu.matmul %0, %1, %cst {dimension_numbers = #tpu.dot_dimension_numbers<[1], [0], [0], [1], [0, 0, 1, 1], [], []>} : vector<8x128xf32>, vector<128x128xf32>, vector<8x128xf32> -> vector<8x128xf32>
    %c0_3 = arith.constant 0 : index
    %c0_4 = arith.constant 0 : index
    %3 = vector.load %arg3[%c0_3, %c0_4] : memref<1x128xf32, #tpu.memory_space<vmem>>, vector<1x128xf32>
    %4 = vector.broadcast %3 : vector<1x128xf32> to vector<8x128xf32>
    %5 = arith.addf %2, %4 : vector<8x128xf32>
    %cst_5 = arith.constant 0.000000e+00 : f32
    %6 = vector.broadcast %cst_5 : f32 to vector<8x128xf32>
    %7 = arith.maximumf %5, %6 : vector<8x128xf32>
    %c0_6 = arith.constant 0 : index
    %c0_7 = arith.constant 0 : index
    %8 = vector.load %arg4[%c0_6, %c0_7] : memref<128x128xf32, #tpu.memory_space<vmem>>, vector<128x128xf32>
    %cst_8 = arith.constant dense<0.000000e+00> : vector<8x128xf32>
    %9 = tpu.matmul %7, %8, %cst_8 {dimension_numbers = #tpu.dot_dimension_numbers<[1], [0], [0], [1], [0, 0, 1, 1], [], []>} : vector<8x128xf32>, vector<128x128xf32>, vector<8x128xf32> -> vector<8x128xf32>
    %c0_9 = arith.constant 0 : index
    %c0_10 = arith.constant 0 : index
    %10 = vector.load %arg5[%c0_9, %c0_10] : memref<1x128xf32, #tpu.memory_space<vmem>>, vector<1x128xf32>
    %11 = vector.broadcast %10 : vector<1x128xf32> to vector<8x128xf32>
    %12 = arith.addf %9, %11 : vector<8x128xf32>
    %cst_11 = arith.constant 0.000000e+00 : f32
    %13 = vector.broadcast %cst_11 : f32 to vector<8x128xf32>
    %14 = arith.maximumf %12, %13 : vector<8x128xf32>
    %c0_12 = arith.constant 0 : index
    %c0_13 = arith.constant 0 : index
    %15 = vector.load %arg6[%c0_12, %c0_13] : memref<8x128xf32, #tpu.memory_space<vmem>>, vector<8x128xf32>
    %cst_14 = arith.constant dense<0.000000e+00> : vector<8x8xf32>
    %16 = tpu.matmul %15, %14, %cst_14 {dimension_numbers = #tpu.dot_dimension_numbers<[1], [1], [0], [0], [0, 0, 1, 0], [], []>} : vector<8x128xf32>, vector<8x128xf32>, vector<8x8xf32> -> vector<8x8xf32>
    %c0_15 = arith.constant 0 : index
    %c0_16 = arith.constant 0 : index
    %17 = vector.load %arg7[%c0_15, %c0_16] : memref<1x1xf32, #tpu.memory_space<vmem>>, vector<1x1xf32>
    %18 = vector.broadcast %17 : vector<1x1xf32> to vector<8x8xf32>
    %19 = arith.addf %16, %18 : vector<8x8xf32>
    %c0_17 = arith.constant 0 : index
    %c0_18 = arith.constant 0 : index
    %20 = vector.load %arg8[%c0_17, %c0_18] : memref<8x8xf32, #tpu.memory_space<vmem>>, vector<8x8xf32>
    tpu.vector_store %arg8[%c0_17, %c0_18], %19 {strides = array<i32>} : memref<8x8xf32, #tpu.memory_space<vmem>>, vector<8x8xf32>,
    return
  }
  func.func @transform_0(%arg0: i32) -> (i32, i32) {
    %c0_i32 = arith.constant 0 : i32
    %c0_i32_0 = arith.constant 0 : i32
    return %arg0, %c0_i32 : i32, i32
  }
  func.func @transform_1(%arg0: i32) -> (i32, i32) {
    %c0_i32 = arith.constant 0 : i32
    %c0_i32_0 = arith.constant 0 : i32
    %c0_i32_1 = arith.constant 0 : i32
    return %c0_i32, %c0_i32_0 : i32, i32
  }
  func.func @transform_2(%arg0: i32) -> (i32, i32) {
    %c0_i32 = arith.constant 0 : i32
    %c0_i32_0 = arith.constant 0 : i32
    %c0_i32_1 = arith.constant 0 : i32
    return %c0_i32, %c0_i32_0 : i32, i32
  }
  func.func @transform_3(%arg0: i32) -> (i32, i32) {
    %c0_i32 = arith.constant 0 : i32
    %c0_i32_0 = arith.constant 0 : i32
    %c0_i32_1 = arith.constant 0 : i32
    return %c0_i32, %c0_i32_0 : i32, i32
  }
  func.func @transform_4(%arg0: i32) -> (i32, i32) {
    %c0_i32 = arith.constant 0 : i32
    %c0_i32_0 = arith.constant 0 : i32
    %c0_i32_1 = arith.constant 0 : i32
    return %c0_i32, %c0_i32_0 : i32, i32
  }
  func.func @transform_5(%arg0: i32) -> (i32, i32) {
    %c0_i32 = arith.constant 0 : i32
    %c0_i32_0 = arith.constant 0 : i32
    %c0_i32_1 = arith.constant 0 : i32
    return %c0_i32, %c0_i32_0 : i32, i32
  }
  func.func @transform_6(%arg0: i32) -> (i32, i32) {
    %c0_i32 = arith.constant 0 : i32
    %c0_i32_0 = arith.constant 0 : i32
    %c0_i32_1 = arith.constant 0 : i32
    return %c0_i32, %c0_i32_0 : i32, i32
  }
  func.func @transform_7(%arg0: i32) -> (i32, i32) {
    %c0_i32 = arith.constant 0 : i32
    %c0_i32_0 = arith.constant 0 : i32
    return %c0_i32, %arg0 : i32, i32
  }
}

module attributes {stable_mosaic.version = 11 : i64} {
  func.func @_fcnn_kernel(%arg0: i32, %arg1: memref<8x128xf32, #tpu.memory_space<vmem>>, %arg2: memref<128x128xf32, #tpu.memory_space<vmem>>, %arg3: memref<1x128xf32, #tpu.memory_space<vmem>>, %arg4: memref<128x128xf32, #tpu.memory_space<vmem>>, %arg5: memref<1x128xf32, #tpu.memory_space<vmem>>, %arg6: memref<8x128xf32, #tpu.memory_space<vmem>>, %arg7: memref<1x1xf32, #tpu.memory_space<vmem>>, %arg8: memref<8x8xf32, #tpu.memory_space<vmem>>) attributes {dimension_semantics = [#tpu.dimension_semantics<parallel>], iteration_bounds = array<i64: 1>, scalar_prefetch = 0 : i64, scratch_operands = 0 : i64, tpu.core_type = #tpu.core_type<tc>, window_params = [{transform_indices = @transform_0, window_bounds = array<i64: 8, 128>}, {pipeline_mode = #tpu.pipeline_mode<synchronous>, transform_indices = @transform_1, window_bounds = array<i64: 128, 128>}, {pipeline_mode = #tpu.pipeline_mode<synchronous>, transform_indices = @transform_2, window_bounds = array<i64: 1, 128>}, {pipeline_mode = #tpu.pipeline_mode<synchronous>, transform_indices = @transform_3, window_bounds = array<i64: 128, 128>}, {pipeline_mode = #tpu.pipeline_mode<synchronous>, transform_indices = @transform_4, window_bounds = array<i64: 1, 128>}, {pipeline_mode = #tpu.pipeline_mode<synchronous>, transform_indices = @transform_5, window_bounds = array<i64: 8, 128>}, {pipeline_mode = #tpu.pipeline_mode<synchronous>, transform_indices = @transform_6, window_bounds = array<i64: 1, 1>}, {transform_indices = @transform_7, window_bounds = array<i64: 8, 8>}]} {
    %c0 = arith.constant 0 : index
    %c0_0 = arith.constant 0 : index
    %0 = vector.load %arg1[%c0, %c0_0] : memref<8x128xf32, #tpu.memory_space<vmem>>, vector<8x128xf32>
    %c0_1 = arith.constant 0 : index
    %c0_2 = arith.constant 0 : index
    %1 = vector.load %arg2[%c0_1, %c0_2] : memref<128x128xf32, #tpu.memory_space<vmem>>, vector<128x128xf32>
    %cst = arith.constant dense<0.000000e+00> : vector<8x128xf32>
    %2 = tpu.matmul %0, %1, %cst {dimension_numbers = #tpu.dot_dimension_numbers<[1], [0], [0], [1], [0, 0, 1, 1], [], []>} : vector<8x128xf32>, vector<128x128xf32>, vector<8x128xf32> -> vector<8x128xf32>
    %c0_3 = arith.constant 0 : index
    %c0_4 = arith.constant 0 : index
    %3 = vector.load %arg3[%c0_3, %c0_4] : memref<1x128xf32, #tpu.memory_space<vmem>>, vector<1x128xf32>
    %4 = vector.broadcast %3 : vector<1x128xf32> to vector<8x128xf32>
    %5 = arith.addf %2, %4 : vector<8x128xf32>
    %cst_5 = arith.constant 0.000000e+00 : f32
    %6 = vector.broadcast %cst_5 : f32 to vector<8x128xf32>
    %7 = arith.maximumf %5, %6 : vector<8x128xf32>
    %c0_6 = arith.constant 0 : index
    %c0_7 = arith.constant 0 : index
    %8 = vector.load %arg4[%c0_6, %c0_7] : memref<128x128xf32, #tpu.memory_space<vmem>>, vector<128x128xf32>
    %cst_8 = arith.constant dense<0.000000e+00> : vector<8x128xf32>
    %9 = tpu.matmul %7, %8, %cst_8 {dimension_numbers = #tpu.dot_dimension_numbers<[1], [0], [0], [1], [0, 0, 1, 1], [], []>} : vector<8x128xf32>, vector<128x128xf32>, vector<8x128xf32> -> vector<8x128xf32>
    %c0_9 = arith.constant 0 : index
    %c0_10 = arith.constant 0 : index
    %10 = vector.load %arg5[%c0_9, %c0_10] : memref<1x128xf32, #tpu.memory_space<vmem>>, vector<1x128xf32>
    %11 = vector.broadcast %10 : vector<1x128xf32> to vector<8x128xf32>
    %12 = arith.addf %9, %11 : vector<8x128xf32>
    %cst_11 = arith.constant 0.000000e+00 : f32
    %13 = vector.broadcast %cst_11 : f32 to vector<8x128xf32>
    %14 = arith.maximumf %12, %13 : vector<8x128xf32>
    %c0_12 = arith.constant 0 : index
    %c0_13 = arith.constant 0 : index
    %15 = vector.load %arg6[%c0_12, %c0_13] : memref<8x128xf32, #tpu.memory_space<vmem>>, vector<8x128xf32>
    %cst_14 = arith.constant dense<0.000000e+00> : vector<8x8xf32>
    %16 = tpu.matmul %15, %14, %cst_14 {dimension_numbers = #tpu.dot_dimension_numbers<[1], [1], [0], [0], [0, 0, 1, 0], [], []>} : vector<8x128xf32>, vector<8x128xf32>, vector<8x8xf32> -> vector<8x8xf32>
    %c0_15 = arith.constant 0 : index
    %c0_16 = arith.constant 0 : index
    %17 = vector.load %arg7[%c0_15, %c0_16] : memref<1x1xf32, #tpu.memory_space<vmem>>, vector<1x1xf32>
    %18 = vector.broadcast %17 : vector<1x1xf32> to vector<8x8xf32>
    %19 = arith.addf %16, %18 : vector<8x8xf32>
    %c0_17 = arith.constant 0 : index
    %c0_18 = arith.constant 0 : index
    %20 = vector.load %arg8[%c0_17, %c0_18] : memref<8x8xf32, #tpu.memory_space<vmem>>, vector<8x8xf32>
    tpu.vector_store %arg8[%c0_17, %c0_18], %19 {strides = array<i32>} : memref<8x8xf32, #tpu.memory_space<vmem>>, vector<8x8xf32>,
    return
  }
  func.func @transform_0(%arg0: i32) -> (i32, i32) {
    %c0_i32 = arith.constant 0 : i32
    %c0_i32_0 = arith.constant 0 : i32
    return %arg0, %c0_i32 : i32, i32
  }
  func.func @transform_1(%arg0: i32) -> (i32, i32) {
    %c0_i32 = arith.constant 0 : i32
    %c0_i32_0 = arith.constant 0 : i32
    %c0_i32_1 = arith.constant 0 : i32
    return %c0_i32, %c0_i32_0 : i32, i32
  }
  func.func @transform_2(%arg0: i32) -> (i32, i32) {
    %c0_i32 = arith.constant 0 : i32
    %c0_i32_0 = arith.constant 0 : i32
    %c0_i32_1 = arith.constant 0 : i32
    return %c0_i32, %c0_i32_0 : i32, i32
  }
  func.func @transform_3(%arg0: i32) -> (i32, i32) {
    %c0_i32 = arith.constant 0 : i32
    %c0_i32_0 = arith.constant 0 : i32
    %c0_i32_1 = arith.constant 0 : i32
    return %c0_i32, %c0_i32_0 : i32, i32
  }
  func.func @transform_4(%arg0: i32) -> (i32, i32) {
    %c0_i32 = arith.constant 0 : i32
    %c0_i32_0 = arith.constant 0 : i32
    %c0_i32_1 = arith.constant 0 : i32
    return %c0_i32, %c0_i32_0 : i32, i32
  }
  func.func @transform_5(%arg0: i32) -> (i32, i32) {
    %c0_i32 = arith.constant 0 : i32
    %c0_i32_0 = arith.constant 0 : i32
    %c0_i32_1 = arith.constant 0 : i32
    return %c0_i32, %c0_i32_0 : i32, i32
  }
  func.func @transform_6(%arg0: i32) -> (i32, i32) {
    %c0_i32 = arith.constant 0 : i32
    %c0_i32_0 = arith.constant 0 : i32
    %c0_i32_1 = arith.constant 0 : i32
    return %c0_i32, %c0_i32_0 : i32, i32
  }
  func.func @transform_7(%arg0: i32) -> (i32, i32) {
    %c0_i32 = arith.constant 0 : i32
    %c0_i32_0 = arith.constant 0 : i32
    return %c0_i32, %arg0 : i32, i32
  }
}

</mosaic_0001>

<bundles_post_ra>
// kernel: tpu_custom_call.1
= control target key start
LH: loop header
LB: loop body
LE: loop exit
PB: predicated region body
PF: predicated region fallthrough
CT: control target
= control target key end

     0   :  { %s762_s0 = inlined_call_operand.hbm [shape: f32[8,128], index: 0, kind: input, shape index: {}]   ;;  %s763_s1 = inlined_call_operand.hbm [shape: f32[128,128], index: 1, kind: input, shape index: {}]   ;;  %s764_s2 = inlined_call_operand.vmem [shape: f32[1,128], index: 2, kind: input, shape index: {}]   ;;  %s765_s3 = inlined_call_operand.hbm [shape: f32[128,128], index: 3, kind: input, shape index: {}]   ;;  %s766_s4 = inlined_call_operand.vmem [shape: f32[1,128], index: 4, kind: input, shape index: {}]   ;;  %s767_s5 = inlined_call_operand.vmem [shape: f32[8,128], index: 5, kind: input, shape index: {}]   ;;  %s768_s6 = inlined_call_operand.<no memory space> [shape: f32[1,1], index: 6, kind: input, shape index: {}]   ;;  %s769_s7 = inlined_call_operand.hbm [shape: f32[8,8], index: 7, kind: output, shape index: {}]  }
   0x1   :  { %v12_v0 = vstv %s768_s6 }
   0x2   :  { %13 = vst [vmem:[#allocation2] sm:$0x1] %v12_v0 }
   0x3   :  { %14 = vsyncpa [#allocation4], 0 }
   0x4   :  { %15 = vsyncpa [#allocation7], 0 }
   0x5   :  { %16 = vsyncpa [#allocation5], 0  ;;  %s623_s26 = smov [#allocation6]   ;;  %s529_s30 = scalar_lea.hbm %s763_s1, 2048 }
   0x6   :  { %s32_s27 = sshll.u32 %s623_s26, 4  ;;  %p530_p0 = scmp.ne.s32.totalorder %s763_s1, %s529_s30  ;;  %s33_s27 = int_to_ptr.vmem [resolvable:$true] %s32_s27 }
   0x7   :  { %p533_p1 = scmp.lt.u32.totalorder %s529_s30, %s763_s1 }
   0x9   :  { %p535_p2 = pnand %p533_p1, %p530_p0 }
   0xb   :  { %538 = shalt.err (!%p535_p2)
}
   0xc   :  { %s539_s6 = scalar_lea.vmem %s33_s27, 2048  ;;  %p544_p4 = scmp.lt.s32.totalorder %s33_s27, %s33_s27 }
   0xd   :  { %p540_p3 = scmp.ne.s32.totalorder %s33_s27, %s539_s6  ;;  %p545_p5 = scmp.lt.s32.totalorder %s539_s6, %s539_s6 }
   0xf   :  { %p546_p6 = por %p545_p5, %p544_p4 }
  0x11   :  { %p547_p7 = pnand %p546_p6, %p540_p3 }
  0x13   :  { %550 = shalt.err (!%p547_p7)
}
  0x14   :  { %s624_s12 = smov 128   ;;  %s625_s13 = smov 8  }
  0x15   :  { %38 = dma.hbm_to_vmem [thread:$0]  %s763_s1, 2048, %s33_s27, [#allocation7], %s624_s12, %s624_s12, %s625_s13  }
  0x16   :  { %s626_s16 = smov [#allocation3]   ;;  %s627_s18 = smov [#allocation8]  }
  0x17   :  { %s23_s17 = sshll.u32 %s626_s16, 4  ;;  %s46_s19 = sshll.u32 %s627_s18, 4  ;;  %s24_s17 = int_to_ptr.vmem [resolvable:$true] %s23_s17  ;;  %s47_s19 = int_to_ptr.vmem [resolvable:$true] %s46_s19 }
  0x18   :  { %s551_s22 = scalar_lea.hbm %s762_s0, 128 }
  0x19   :  { %p552_p8 = scmp.ne.s32.totalorder %s762_s0, %s551_s22  ;;  %p555_p9 = scmp.lt.u32.totalorder %s551_s22, %s762_s0 }
  0x1b   :  { %p557_p10 = pnand %p555_p9, %p552_p8 }
  0x1d   :  { %560 = shalt.err (!%p557_p10)
}
  0x1e   :  { %s561_s1 = scalar_lea.vmem %s24_s17, 128  ;;  %p566_p12 = scmp.lt.s32.totalorder %s24_s17, %s24_s17 }
  0x1f   :  { %p562_p11 = scmp.ne.s32.totalorder %s24_s17, %s561_s1  ;;  %p567_p13 = scmp.lt.s32.totalorder %s561_s1, %s561_s1 }
  0x21   :  { %p568_p0 = por %p567_p13, %p566_p12 }
  0x23   :  { %p569_p1 = pnand %p568_p0, %p562_p11 }
  0x25   :  { %572 = shalt.err (!%p569_p1)
}
  0x26   :  { %26 = dma.hbm_to_vmem [thread:$0]  %s762_s0, 128, %s24_s17, [#allocation4]  }
  0x27   :  { %s573_s8 = scalar_lea.hbm %s765_s3, 2048 }
  0x28   :  { %p574_p2 = scmp.ne.s32.totalorder %s765_s3, %s573_s8  ;;  %p577_p3 = scmp.lt.u32.totalorder %s573_s8, %s765_s3 }
  0x2a   :  { %p579_p4 = pnand %p577_p3, %p574_p2 }
  0x2c   :  { %582 = shalt.err (!%p579_p4)
}
  0x2d   :  { %s583_s14 = scalar_lea.vmem %s47_s19, 2048  ;;  %p588_p6 = scmp.lt.s32.totalorder %s47_s19, %s47_s19 }
  0x2e   :  { %p584_p5 = scmp.ne.s32.totalorder %s47_s19, %s583_s14  ;;  %p589_p7 = scmp.lt.s32.totalorder %s583_s14, %s583_s14 }
  0x30   :  { %p590_p8 = por %p589_p7, %p588_p6 }
  0x32   :  { %p591_p9 = pnand %p590_p8, %p584_p5 }
  0x34   :  { %594 = shalt.err (!%p591_p9)
}
  0x35   :  { %52 = dma.hbm_to_vmem [thread:$0]  %s765_s3, 2048, %s47_s19, [#allocation7], %s624_s12, %s624_s12, %s625_s13  }
  0x36   :  { %617 = dma.done.wait [#allocation4], 128  }
  0x37   :  { %618 = vsyncadd [#allocation4], 4294967168 }
  0x38   :  { %619 = dma.done.wait [#allocation7], 4096  }
  0x39   :  { %620 = vsyncadd [#allocation7], 4294963200  ;;  %v628_v1 = vmov 0.0|0.0   ;;  %vm629_vm0 = vmmov 0   ;;  %v630_v2 = vmov 0.0   ;;  %v69_v3 = vld [vmem:[#allocation6] sm:$0xff] }
  0x3a   :  { %470 = vmatprep.subr.bf16.mxu0 %v628_v1  ;;  %427 = vmatprep.mubr.msk.f32.mxu0 %vm629_vm0, %v630_v2  ;;  %v70_v4 = vld [vmem:[#allocation6 + $0x8] sm:$0xff]  ;;  %v71_v5 = vld [vmem:[#allocation6 + $0x10] sm:$0xff]  ;;  %v72_v7 = vld [vmem:[#allocation6 + $0x18] sm:$0xff]  ;;  %v631_v58 = vmov 0   ;;  %s632_s18 = smov [#allocation9]   ;;  %vm338_vm1 = vcmask 64512  }
  0x3b   :  { %494 = vmatprep.subr.bf16.mxu1 %v628_v1  ;;  %462 = vmatprep.mubr.msk.f32.mxu1 %vm629_vm0, %v630_v2  ;;  %v471_v6 = vpack.c.bf16 %v70_v4, %v69_v3  ;;  %v474_v8 = vpack.c.bf16 %v72_v7, %v71_v5  ;;  %v73_v9 = vld [vmem:[#allocation6 + $0x20] sm:$0xff]  ;;  %v74_v10 = vld [vmem:[#allocation6 + $0x28] sm:$0xff]  ;;  %v165_v13 = vld [vmem:[#allocation8 + $0x10] sm:$0xff]  ;;  %s346_s19 = sshll.u32 %s632_s18, 4  ;;  %s347_s19 = int_to_ptr.vmem [resolvable:$true] %s346_s19 }
  0x3c   :  { %v163_v11 = vld [vmem:[#allocation8] sm:$0xff]  ;;  %v164_v12 = vld [vmem:[#allocation8 + $0x8] sm:$0xff]  ;;  %v166_v14 = vld [vmem:[#allocation8 + $0x18] sm:$0xff]  ;;  %v477_v15 = vpack.c.bf16 %v74_v10, %v73_v9  ;;  %528 = vset.pattern.permute.xlu0 %v631_v58  ;;  %p600_p11 = scmp.lt.s32.totalorder %s347_s19, %s347_s19 }
  0x3d   :  { %472 = vmatpush3.bf16.msra.mxu0 %v471_v6  ;;  %v495_v16 = vpack.c.bf16 %v164_v12, %v163_v11  ;;  %v75_v17 = vld [vmem:[#allocation6 + $0x30] sm:$0xff]  ;;  %v76_v18 = vld [vmem:[#allocation6 + $0x38] sm:$0xff]  ;;  %v498_v19 = vpack.c.bf16 %v166_v14, %v165_v13  ;;  %v167_v20 = vld [vmem:[#allocation8 + $0x20] sm:$0xff] }
  0x3e   :  { %473 = vmatprep.subr.bf16.mxu0 %v628_v1  ;;  %v168_v21 = vld [vmem:[#allocation8 + $0x28] sm:$0xff]  ;;  %v480_v22 = vpack.c.bf16 %v76_v18, %v75_v17  ;;  %v77_v23 = vld [vmem:[#allocation6 + $0x40] sm:$0xff]  ;;  %v169_v26 = vld [vmem:[#allocation8 + $0x30] sm:$0xff] }
  0x3f   :  { %496 = vmatpush3.bf16.msra.mxu1 %v495_v16  ;;  %v78_v24 = vld [vmem:[#allocation6 + $0x48] sm:$0xff]  ;;  %v501_v25 = vpack.c.bf16 %v168_v21, %v167_v20  ;;  %v170_v27 = vld [vmem:[#allocation8 + $0x38] sm:$0xff]  ;;  %v79_v29 = vld [vmem:[#allocation6 + $0x50] sm:$0xff] }
  0x40   :  { %497 = vmatprep.subr.bf16.mxu1 %v628_v1  ;;  %v483_v28 = vpack.c.bf16 %v78_v24, %v77_v23  ;;  %v80_v30 = vld [vmem:[#allocation6 + $0x58] sm:$0xff]  ;;  %v504_v31 = vpack.c.bf16 %v170_v27, %v169_v26  ;;  %v171_v32 = vld [vmem:[#allocation8 + $0x40] sm:$0xff]  ;;  %v172_v33 = vld [vmem:[#allocation8 + $0x48] sm:$0xff] }
  0x41   :  { %475 = vmatpush3.bf16.msra.mxu0 %v474_v8  ;;  %v486_v34 = vpack.c.bf16 %v80_v30, %v79_v29  ;;  %v81_v35 = vld [vmem:[#allocation6 + $0x60] sm:$0xff]  ;;  %v82_v36 = vld [vmem:[#allocation6 + $0x68] sm:$0xff]  ;;  %v507_v37 = vpack.c.bf16 %v172_v33, %v171_v32  ;;  %v173_v38 = vld [vmem:[#allocation8 + $0x50] sm:$0xff] }
  0x42   :  { %476 = vmatprep.subr.bf16.mxu0 %v628_v1  ;;  %v174_v39 = vld [vmem:[#allocation8 + $0x58] sm:$0xff]  ;;  %v489_v40 = vpack.c.bf16 %v82_v36, %v81_v35  ;;  %v83_v41 = vld [vmem:[#allocation6 + $0x70] sm:$0xff]  ;;  %v175_v44 = vld [vmem:[#allocation8 + $0x60] sm:$0xff] }
  0x43   :  { %499 = vmatpush3.bf16.msra.mxu1 %v498_v19  ;;  %v84_v42 = vld [vmem:[#allocation6 + $0x78] sm:$0xff]  ;;  %v510_v43 = vpack.c.bf16 %v174_v39, %v173_v38  ;;  %v176_v45 = vld [vmem:[#allocation8 + $0x68] sm:$0xff]  ;;  %v177_v49 = vld [vmem:[#allocation8 + $0x70] sm:$0xff] }
  0x44   :  { %500 = vmatprep.subr.bf16.mxu1 %v628_v1  ;;  %v492_v46 = vpack.c.bf16 %v84_v42, %v83_v41  ;;  %v513_v47 = vpack.c.bf16 %v176_v45, %v175_v44  ;;  %v68_v48 = vld [vmem:[#allocation3] sm:$0xff]  ;;  %v356_v52 = vld [vmem:[%s764_s2] ss:$0 sm:$0xff] }
  0x45   :  { %478 = vmatpush3.bf16.msra.mxu0 %v477_v15  ;;  %v178_v50 = vld [vmem:[#allocation8 + $0x78] sm:$0xff]  ;;  %v358_v57 = vld [vmem:[#allocation2] ss:$0 sm:$0xff] }
  0x46   :  { %479 = vmatprep.subr.bf16.mxu0 %v628_v1  ;;  %v516_v51 = vpack.c.bf16 %v178_v50, %v177_v49  ;;  %265 = vperm.xlu0 %528, %v358_v57   ;;  %v357_v59 = vld [vmem:[%s766_s4] ss:$0 sm:$0xff]  ;;  %s595_s4 = scalar_lea.vmem %s347_s19, 128 }
  0x47   :  { %502 = vmatpush3.bf16.msra.mxu1 %v501_v25  ;;  %v257_v0 = vld [vmem:[%s767_s5] sm:$0xff]  ;;  %p596_p10 = scmp.ne.s32.totalorder %s347_s19, %s595_s4  ;;  %p601_p12 = scmp.lt.s32.totalorder %s595_s4, %s595_s4 }
  0x48   :  { %503 = vmatprep.subr.bf16.mxu1 %v628_v1 }
  0x49   :  { %481 = vmatpush3.bf16.msra.mxu0 %v480_v22  ;;  %p602_p13 = por %p601_p12, %p600_p11 }
  0x4a   :  { %482 = vmatprep.subr.bf16.mxu0 %v628_v1 }
  0x4b   :  { %505 = vmatpush3.bf16.msra.mxu1 %v504_v31  ;;  %p603_p0 = pnand %p602_p13, %p596_p10 }
  0x4c   :  { %506 = vmatprep.subr.bf16.mxu1 %v628_v1 }
  0x4d   :  { %484 = vmatpush3.bf16.msra.mxu0 %v483_v28 }
  0x4e   :  { %485 = vmatprep.subr.bf16.mxu0 %v628_v1 }
  0x4f   :  { %508 = vmatpush3.bf16.msra.mxu1 %v507_v37 }
  0x50   :  { %509 = vmatprep.subr.bf16.mxu1 %v628_v1 }
  0x51   :  { %487 = vmatpush3.bf16.msra.mxu0 %v486_v34 }
  0x52   :  { %488 = vmatprep.subr.bf16.mxu0 %v628_v1 }
  0x53   :  { %511 = vmatpush3.bf16.msra.mxu1 %v510_v43 }
  0x54   :  { %512 = vmatprep.subr.bf16.mxu1 %v628_v1 }
  0x55   :  { %490 = vmatpush3.bf16.msra.mxu0 %v489_v40 }
  0x56   :  { %491 = vmatprep.subr.bf16.mxu0 %v628_v1 }
  0x57   :  { %514 = vmatpush3.bf16.msra.mxu1 %v513_v47 }
  0x58   :  { %515 = vmatprep.subr.bf16.mxu1 %v628_v1 }
  0x59   :  { %493 = vmatpush3.bf16.msra.mxu0 %v492_v46 }
  0x5a   :  { %465 = vmatprep.subr.mxu0 %v630_v2 }
  0x5b   :  { %517 = vmatpush3.bf16.msra.mxu1 %v516_v51 }
  0x5c   :  { %428 = vmatmul.mubr.f32.vlgmr.msra.gmra.mrb[0].mxu0 %v68_v48 }
  0x5d   :  { %467 = vmatprep.mubr.msk.f32.mxu0 %vm629_vm0, %v630_v2 }
  0xc5   :  { %v266_v1 = vpop.permute.xlu0 %265 }
 0x12f   :  { %v158_v53 = vpop.f32.mrb[0].mxu0 }
 0x130   :  { %v159_v54 = vadd.f32 %v356_v52, %v158_v53  ;;  %v429_v55 = vpop.f32.mrb[1].mxu0 }
 0x132   :  { %v162_v56 = vmax.f32 %v159_v54, 0.0 }
 0x134   :  { %463 = vmatmul.mubr.f32.vlgmr.msra.gmra.mrb[0].mxu1 %v162_v56 }
 0x207   :  { %v252_v60 = vpop.f32.mrb[0].mxu1 }
 0x208   :  { %v253_v61 = vadd.f32 %v357_v59, %v252_v60  ;;  %v464_v62 = vpop.f32.mrb[1].mxu1 }
 0x20a   :  { %v256_v63 = vmax.f32 %v253_v61, 0.0 }
 0x20c   :  { %466 = vmatpush3.xpose.msra.mxu0 %v256_v63 }
 0x20f   :  { %468 = vmatmul.mubr.f32.vlgmr.msra.gmra.mrb[2].mxu0 %v257_v0 }
 0x2e2   :  { %v334_v2 = vpop.f32.mrb[2].mxu0 }
 0x2e3   :  { %v335_v3 = vadd.f32 %v334_v2, %v266_v1  ;;  %v469_v4 = vpop.f32.mrb[3].mxu0 }
 0x2e5   :  { %339 = vst.msk [vmem:[#allocation9] sm:$0xff] %vm338_vm1, %v335_v3 }
 0x2e6   :  { %606 = shalt.err (!%p603_p0)
}
 0x2e7   :  { %s607_s5 = scalar_lea.hbm %s769_s7, 128 }
 0x2e8   :  { %p608_p1 = scmp.ne.s32.totalorder %s769_s7, %s607_s5  ;;  %p611_p2 = scmp.lt.u32.totalorder %s607_s5, %s769_s7 }
 0x2ea   :  { %p613_p3 = pnand %p611_p2, %p608_p1 }
 0x2ec   :  { %616 = shalt.err (!%p613_p3)
}
 0x2ed   :  { %349 = dma.vmem_to_hbm [thread:$0]  %s347_s19, 128, %s769_s7, [#allocation5]  }
 0x2ee   :  { %621 = dma.done.wait [#allocation5], 128  }
 0x2ef   :  { %622 = vsyncadd [#allocation5], 4294967168 }
 0x2f0   :  { %353 = vsyncpa [#allocation4], 1 }
 0x2f1   :  { %354 = vsyncpa [#allocation7], 1 }
 0x2f2   :  { %355 = vsyncpa [#allocation5], 1 }

// kernel: tpu_custom_call.1
= control target key start
LH: loop header
LB: loop body
LE: loop exit
PB: predicated region body
PF: predicated region fallthrough
CT: control target
= control target key end

     0   :  { %s762_s0 = inlined_call_operand.hbm [shape: f32[8,128], index: 0, kind: input, shape index: {}]   ;;  %s763_s1 = inlined_call_operand.hbm [shape: f32[128,128], index: 1, kind: input, shape index: {}]   ;;  %s764_s2 = inlined_call_operand.vmem [shape: f32[1,128], index: 2, kind: input, shape index: {}]   ;;  %s765_s3 = inlined_call_operand.hbm [shape: f32[128,128], index: 3, kind: input, shape index: {}]   ;;  %s766_s4 = inlined_call_operand.vmem [shape: f32[1,128], index: 4, kind: input, shape index: {}]   ;;  %s767_s5 = inlined_call_operand.vmem [shape: f32[8,128], index: 5, kind: input, shape index: {}]   ;;  %s768_s6 = inlined_call_operand.<no memory space> [shape: f32[1,1], index: 6, kind: input, shape index: {}]   ;;  %s769_s7 = inlined_call_operand.hbm [shape: f32[8,8], index: 7, kind: output, shape index: {}]  }
   0x1   :  { %v12_v0 = vstv %s768_s6 }
   0x2   :  { %13 = vst [vmem:[#allocation2] sm:$0x1] %v12_v0 }
   0x3   :  { %14 = vsyncpa [#allocation4], 0 }
   0x4   :  { %15 = vsyncpa [#allocation7], 0 }
   0x5   :  { %16 = vsyncpa [#allocation5], 0  ;;  %s623_s26 = smov [#allocation6]   ;;  %s529_s30 = scalar_lea.hbm %s763_s1, 2048 }
   0x6   :  { %s32_s27 = sshll.u32 %s623_s26, 4  ;;  %p530_p0 = scmp.ne.s32.totalorder %s763_s1, %s529_s30  ;;  %s33_s27 = int_to_ptr.vmem [resolvable:$true] %s32_s27 }
   0x7   :  { %p533_p1 = scmp.lt.u32.totalorder %s529_s30, %s763_s1 }
   0x9   :  { %p535_p2 = pnand %p533_p1, %p530_p0 }
   0xb   :  { %538 = shalt.err (!%p535_p2)
}
   0xc   :  { %s539_s6 = scalar_lea.vmem %s33_s27, 2048  ;;  %p544_p4 = scmp.lt.s32.totalorder %s33_s27, %s33_s27 }
   0xd   :  { %p540_p3 = scmp.ne.s32.totalorder %s33_s27, %s539_s6  ;;  %p545_p5 = scmp.lt.s32.totalorder %s539_s6, %s539_s6 }
   0xf   :  { %p546_p6 = por %p545_p5, %p544_p4 }
  0x11   :  { %p547_p7 = pnand %p546_p6, %p540_p3 }
  0x13   :  { %550 = shalt.err (!%p547_p7)
}
  0x14   :  { %s624_s12 = smov 128   ;;  %s625_s13 = smov 8  }
  0x15   :  { %38 = dma.hbm_to_vmem [thread:$0]  %s763_s1, 2048, %s33_s27, [#allocation7], %s624_s12, %s624_s12, %s625_s13  }
  0x16   :  { %s626_s16 = smov [#allocation3]   ;;  %s627_s18 = smov [#allocation8]  }
  0x17   :  { %s23_s17 = sshll.u32 %s626_s16, 4  ;;  %s46_s19 = sshll.u32 %s627_s18, 4  ;;  %s24_s17 = int_to_ptr.vmem [resolvable:$true] %s23_s17  ;;  %s47_s19 = int_to_ptr.vmem [resolvable:$true] %s46_s19 }
  0x18   :  { %s551_s22 = scalar_lea.hbm %s762_s0, 128 }
  0x19   :  { %p552_p8 = scmp.ne.s32.totalorder %s762_s0, %s551_s22  ;;  %p555_p9 = scmp.lt.u32.totalorder %s551_s22, %s762_s0 }
  0x1b   :  { %p557_p10 = pnand %p555_p9, %p552_p8 }
  0x1d   :  { %560 = shalt.err (!%p557_p10)
}
  0x1e   :  { %s561_s1 = scalar_lea.vmem %s24_s17, 128  ;;  %p566_p12 = scmp.lt.s32.totalorder %s24_s17, %s24_s17 }
  0x1f   :  { %p562_p11 = scmp.ne.s32.totalorder %s24_s17, %s561_s1  ;;  %p567_p13 = scmp.lt.s32.totalorder %s561_s1, %s561_s1 }
  0x21   :  { %p568_p0 = por %p567_p13, %p566_p12 }
  0x23   :  { %p569_p1 = pnand %p568_p0, %p562_p11 }
  0x25   :  { %572 = shalt.err (!%p569_p1)
}
  0x26   :  { %26 = dma.hbm_to_vmem [thread:$0]  %s762_s0, 128, %s24_s17, [#allocation4]  }
  0x27   :  { %s573_s8 = scalar_lea.hbm %s765_s3, 2048 }
  0x28   :  { %p574_p2 = scmp.ne.s32.totalorder %s765_s3, %s573_s8  ;;  %p577_p3 = scmp.lt.u32.totalorder %s573_s8, %s765_s3 }
  0x2a   :  { %p579_p4 = pnand %p577_p3, %p574_p2 }
  0x2c   :  { %582 = shalt.err (!%p579_p4)
}
  0x2d   :  { %s583_s14 = scalar_lea.vmem %s47_s19, 2048  ;;  %p588_p6 = scmp.lt.s32.totalorder %s47_s19, %s47_s19 }
  0x2e   :  { %p584_p5 = scmp.ne.s32.totalorder %s47_s19, %s583_s14  ;;  %p589_p7 = scmp.lt.s32.totalorder %s583_s14, %s583_s14 }
  0x30   :  { %p590_p8 = por %p589_p7, %p588_p6 }
  0x32   :  { %p591_p9 = pnand %p590_p8, %p584_p5 }
  0x34   :  { %594 = shalt.err (!%p591_p9)
}
  0x35   :  { %52 = dma.hbm_to_vmem [thread:$0]  %s765_s3, 2048, %s47_s19, [#allocation7], %s624_s12, %s624_s12, %s625_s13  }
  0x36   :  { %617 = dma.done.wait [#allocation4], 128  }
  0x37   :  { %618 = vsyncadd [#allocation4], 4294967168 }
  0x38   :  { %619 = dma.done.wait [#allocation7], 4096  }
  0x39   :  { %620 = vsyncadd [#allocation7], 4294963200  ;;  %v628_v1 = vmov 0.0|0.0   ;;  %vm629_vm0 = vmmov 0   ;;  %v630_v2 = vmov 0.0   ;;  %v69_v3 = vld [vmem:[#allocation6] sm:$0xff] }
  0x3a   :  { %470 = vmatprep.subr.bf16.mxu0 %v628_v1  ;;  %427 = vmatprep.mubr.msk.f32.mxu0 %vm629_vm0, %v630_v2  ;;  %v70_v4 = vld [vmem:[#allocation6 + $0x8] sm:$0xff]  ;;  %v71_v5 = vld [vmem:[#allocation6 + $0x10] sm:$0xff]  ;;  %v72_v7 = vld [vmem:[#allocation6 + $0x18] sm:$0xff]  ;;  %v631_v58 = vmov 0   ;;  %s632_s18 = smov [#allocation9]   ;;  %vm338_vm1 = vcmask 64512  }
  0x3b   :  { %494 = vmatprep.subr.bf16.mxu1 %v628_v1  ;;  %462 = vmatprep.mubr.msk.f32.mxu1 %vm629_vm0, %v630_v2  ;;  %v471_v6 = vpack.c.bf16 %v70_v4, %v69_v3  ;;  %v474_v8 = vpack.c.bf16 %v72_v7, %v71_v5  ;;  %v73_v9 = vld [vmem:[#allocation6 + $0x20] sm:$0xff]  ;;  %v74_v10 = vld [vmem:[#allocation6 + $0x28] sm:$0xff]  ;;  %v165_v13 = vld [vmem:[#allocation8 + $0x10] sm:$0xff]  ;;  %s346_s19 = sshll.u32 %s632_s18, 4  ;;  %s347_s19 = int_to_ptr.vmem [resolvable:$true] %s346_s19 }
  0x3c   :  { %v163_v11 = vld [vmem:[#allocation8] sm:$0xff]  ;;  %v164_v12 = vld [vmem:[#allocation8 + $0x8] sm:$0xff]  ;;  %v166_v14 = vld [vmem:[#allocation8 + $0x18] sm:$0xff]  ;;  %v477_v15 = vpack.c.bf16 %v74_v10, %v73_v9  ;;  %528 = vset.pattern.permute.xlu0 %v631_v58  ;;  %p600_p11 = scmp.lt.s32.totalorder %s347_s19, %s347_s19 }
  0x3d   :  { %472 = vmatpush3.bf16.msra.mxu0 %v471_v6  ;;  %v495_v16 = vpack.c.bf16 %v164_v12, %v163_v11  ;;  %v75_v17 = vld [vmem:[#allocation6 + $0x30] sm:$0xff]  ;;  %v76_v18 = vld [vmem:[#allocation6 + $0x38] sm:$0xff]  ;;  %v498_v19 = vpack.c.bf16 %v166_v14, %v165_v13  ;;  %v167_v20 = vld [vmem:[#allocation8 + $0x20] sm:$0xff] }
  0x3e   :  { %473 = vmatprep.subr.bf16.mxu0 %v628_v1  ;;  %v168_v21 = vld [vmem:[#allocation8 + $0x28] sm:$0xff]  ;;  %v480_v22 = vpack.c.bf16 %v76_v18, %v75_v17  ;;  %v77_v23 = vld [vmem:[#allocation6 + $0x40] sm:$0xff]  ;;  %v169_v26 = vld [vmem:[#allocation8 + $0x30] sm:$0xff] }
  0x3f   :  { %496 = vmatpush3.bf16.msra.mxu1 %v495_v16  ;;  %v78_v24 = vld [vmem:[#allocation6 + $0x48] sm:$0xff]  ;;  %v501_v25 = vpack.c.bf16 %v168_v21, %v167_v20  ;;  %v170_v27 = vld [vmem:[#allocation8 + $0x38] sm:$0xff]  ;;  %v79_v29 = vld [vmem:[#allocation6 + $0x50] sm:$0xff] }
  0x40   :  { %497 = vmatprep.subr.bf16.mxu1 %v628_v1  ;;  %v483_v28 = vpack.c.bf16 %v78_v24, %v77_v23  ;;  %v80_v30 = vld [vmem:[#allocation6 + $0x58] sm:$0xff]  ;;  %v504_v31 = vpack.c.bf16 %v170_v27, %v169_v26  ;;  %v171_v32 = vld [vmem:[#allocation8 + $0x40] sm:$0xff]  ;;  %v172_v33 = vld [vmem:[#allocation8 + $0x48] sm:$0xff] }
  0x41   :  { %475 = vmatpush3.bf16.msra.mxu0 %v474_v8  ;;  %v486_v34 = vpack.c.bf16 %v80_v30, %v79_v29  ;;  %v81_v35 = vld [vmem:[#allocation6 + $0x60] sm:$0xff]  ;;  %v82_v36 = vld [vmem:[#allocation6 + $0x68] sm:$0xff]  ;;  %v507_v37 = vpack.c.bf16 %v172_v33, %v171_v32  ;;  %v173_v38 = vld [vmem:[#allocation8 + $0x50] sm:$0xff] }
  0x42   :  { %476 = vmatprep.subr.bf16.mxu0 %v628_v1  ;;  %v174_v39 = vld [vmem:[#allocation8 + $0x58] sm:$0xff]  ;;  %v489_v40 = vpack.c.bf16 %v82_v36, %v81_v35  ;;  %v83_v41 = vld [vmem:[#allocation6 + $0x70] sm:$0xff]  ;;  %v175_v44 = vld [vmem:[#allocation8 + $0x60] sm:$0xff] }
  0x43   :  { %499 = vmatpush3.bf16.msra.mxu1 %v498_v19  ;;  %v84_v42 = vld [vmem:[#allocation6 + $0x78] sm:$0xff]  ;;  %v510_v43 = vpack.c.bf16 %v174_v39, %v173_v38  ;;  %v176_v45 = vld [vmem:[#allocation8 + $0x68] sm:$0xff]  ;;  %v177_v49 = vld [vmem:[#allocation8 + $0x70] sm:$0xff] }
  0x44   :  { %500 = vmatprep.subr.bf16.mxu1 %v628_v1  ;;  %v492_v46 = vpack.c.bf16 %v84_v42, %v83_v41  ;;  %v513_v47 = vpack.c.bf16 %v176_v45, %v175_v44  ;;  %v68_v48 = vld [vmem:[#allocation3] sm:$0xff]  ;;  %v356_v52 = vld [vmem:[%s764_s2] ss:$0 sm:$0xff] }
  0x45   :  { %478 = vmatpush3.bf16.msra.mxu0 %v477_v15  ;;  %v178_v50 = vld [vmem:[#allocation8 + $0x78] sm:$0xff]  ;;  %v358_v57 = vld [vmem:[#allocation2] ss:$0 sm:$0xff] }
  0x46   :  { %479 = vmatprep.subr.bf16.mxu0 %v628_v1  ;;  %v516_v51 = vpack.c.bf16 %v178_v50, %v177_v49  ;;  %265 = vperm.xlu0 %528, %v358_v57   ;;  %v357_v59 = vld [vmem:[%s766_s4] ss:$0 sm:$0xff]  ;;  %s595_s4 = scalar_lea.vmem %s347_s19, 128 }
  0x47   :  { %502 = vmatpush3.bf16.msra.mxu1 %v501_v25  ;;  %v257_v0 = vld [vmem:[%s767_s5] sm:$0xff]  ;;  %p596_p10 = scmp.ne.s32.totalorder %s347_s19, %s595_s4  ;;  %p601_p12 = scmp.lt.s32.totalorder %s595_s4, %s595_s4 }
  0x48   :  { %503 = vmatprep.subr.bf16.mxu1 %v628_v1 }
  0x49   :  { %481 = vmatpush3.bf16.msra.mxu0 %v480_v22  ;;  %p602_p13 = por %p601_p12, %p600_p11 }
  0x4a   :  { %482 = vmatprep.subr.bf16.mxu0 %v628_v1 }
  0x4b   :  { %505 = vmatpush3.bf16.msra.mxu1 %v504_v31  ;;  %p603_p0 = pnand %p602_p13, %p596_p10 }
  0x4c   :  { %506 = vmatprep.subr.bf16.mxu1 %v628_v1 }
  0x4d   :  { %484 = vmatpush3.bf16.msra.mxu0 %v483_v28 }
  0x4e   :  { %485 = vmatprep.subr.bf16.mxu0 %v628_v1 }
  0x4f   :  { %508 = vmatpush3.bf16.msra.mxu1 %v507_v37 }
  0x50   :  { %509 = vmatprep.subr.bf16.mxu1 %v628_v1 }
  0x51   :  { %487 = vmatpush3.bf16.msra.mxu0 %v486_v34 }
  0x52   :  { %488 = vmatprep.subr.bf16.mxu0 %v628_v1 }
  0x53   :  { %511 = vmatpush3.bf16.msra.mxu1 %v510_v43 }
  0x54   :  { %512 = vmatprep.subr.bf16.mxu1 %v628_v1 }
  0x55   :  { %490 = vmatpush3.bf16.msra.mxu0 %v489_v40 }
  0x56   :  { %491 = vmatprep.subr.bf16.mxu0 %v628_v1 }
  0x57   :  { %514 = vmatpush3.bf16.msra.mxu1 %v513_v47 }
  0x58   :  { %515 = vmatprep.subr.bf16.mxu1 %v628_v1 }
  0x59   :  { %493 = vmatpush3.bf16.msra.mxu0 %v492_v46 }
  0x5a   :  { %465 = vmatprep.subr.mxu0 %v630_v2 }
  0x5b   :  { %517 = vmatpush3.bf16.msra.mxu1 %v516_v51 }
  0x5c   :  { %428 = vmatmul.mubr.f32.vlgmr.msra.gmra.mrb[0].mxu0 %v68_v48 }
  0x5d   :  { %467 = vmatprep.mubr.msk.f32.mxu0 %vm629_vm0, %v630_v2 }
  0xc5   :  { %v266_v1 = vpop.permute.xlu0 %265 }
 0x12f   :  { %v158_v53 = vpop.f32.mrb[0].mxu0 }
 0x130   :  { %v159_v54 = vadd.f32 %v356_v52, %v158_v53  ;;  %v429_v55 = vpop.f32.mrb[1].mxu0 }
 0x132   :  { %v162_v56 = vmax.f32 %v159_v54, 0.0 }
 0x134   :  { %463 = vmatmul.mubr.f32.vlgmr.msra.gmra.mrb[0].mxu1 %v162_v56 }
 0x207   :  { %v252_v60 = vpop.f32.mrb[0].mxu1 }
 0x208   :  { %v253_v61 = vadd.f32 %v357_v59, %v252_v60  ;;  %v464_v62 = vpop.f32.mrb[1].mxu1 }
 0x20a   :  { %v256_v63 = vmax.f32 %v253_v61, 0.0 }
 0x20c   :  { %466 = vmatpush3.xpose.msra.mxu0 %v256_v63 }
 0x20f   :  { %468 = vmatmul.mubr.f32.vlgmr.msra.gmra.mrb[2].mxu0 %v257_v0 }
 0x2e2   :  { %v334_v2 = vpop.f32.mrb[2].mxu0 }
 0x2e3   :  { %v335_v3 = vadd.f32 %v334_v2, %v266_v1  ;;  %v469_v4 = vpop.f32.mrb[3].mxu0 }
 0x2e5   :  { %339 = vst.msk [vmem:[#allocation9] sm:$0xff] %vm338_vm1, %v335_v3 }
 0x2e6   :  { %606 = shalt.err (!%p603_p0)
}
 0x2e7   :  { %s607_s5 = scalar_lea.hbm %s769_s7, 128 }
 0x2e8   :  { %p608_p1 = scmp.ne.s32.totalorder %s769_s7, %s607_s5  ;;  %p611_p2 = scmp.lt.u32.totalorder %s607_s5, %s769_s7 }
 0x2ea   :  { %p613_p3 = pnand %p611_p2, %p608_p1 }
 0x2ec   :  { %616 = shalt.err (!%p613_p3)
}
 0x2ed   :  { %349 = dma.vmem_to_hbm [thread:$0]  %s347_s19, 128, %s769_s7, [#allocation5]  }
 0x2ee   :  { %621 = dma.done.wait [#allocation5], 128  }
 0x2ef   :  { %622 = vsyncadd [#allocation5], 4294967168 }
 0x2f0   :  { %353 = vsyncpa [#allocation4], 1 }
 0x2f1   :  { %354 = vsyncpa [#allocation7], 1 }
 0x2f2   :  { %355 = vsyncpa [#allocation5], 1 }

</bundles_post_ra>
